<compile_context>
chip_gen: v6e
topology: v6e:2x2x1
jax: 0.10.0
libtpu: 0.0.40
codegen_flags: <defaults>
</compile_context>

<pallas_src>
import functools

import jax
import jax.numpy as jnp
from jax import lax
from jax.experimental import pallas as pl
from jax.experimental.pallas import tpu as pltpu

_EPS = 1e-5


# ---------------------------------------------------------------------------
# Host-side weight prep: 3x3 OIHW -> block-banded matrix (W*Cin, 3*W*Cout).
# Column group kh holds the band matrix for kernel row kh:
#   B[kh][(wi*Cin + ci), (w*Cout + co)] = weight[co, ci, kh, kw] iff
#   wi == w + kw - 1 (stride 1, padding 1), else 0.
# ---------------------------------------------------------------------------
def _band_conv_weights(w_oihw, width):
    c_out, c_in, k_h, k_w = w_oihw.shape
    wt = jnp.transpose(w_oihw, (2, 3, 1, 0))            # (KH, KW, Cin, Cout)
    idx = jnp.arange(width)
    groups = []
    for kh in range(k_h):
        band = jnp.zeros((width * c_in, width * c_out), wt.dtype)
        for kw in range(k_w):
            sel = (idx[:, None] == idx[None, :] + (kw - 1)).astype(wt.dtype)
            band = band + jnp.kron(sel, wt[kh, kw])
        groups.append(band)
    return jnp.concatenate(groups, axis=1)               # (W*Cin, 3*W*Cout)


# ---------------------------------------------------------------------------
# In-kernel conv: one fat MXU matmul + two XLU rolls (with per-image masks).
# ---------------------------------------------------------------------------
def _band_conv(act2d, wall, wc_out, h):
    """3x3 conv (stride 1, pad 1) on a flattened (B_tile*H, W*Cin) slab."""
    rows = act2d.shape[0]
    p = jnp.dot(act2d, wall, preferred_element_type=jnp.float32)  # (rows, 3*wc_out)
    p0 = p[:, :wc_out]               # kernel row 0: out[r] needs p0[r-1]
    p1 = p[:, wc_out:2 * wc_out]     # kernel row 1: aligned
    p2 = p[:, 2 * wc_out:]           # kernel row 2: out[r] needs p2[r+1]
    # Row shifts on the XLU; per-image H zero-padding via boundary masks
    # (row % h == 0 / h-1 rows get no cross-row contribution).
    row_in_img = lax.broadcasted_iota(jnp.int32, (rows, wc_out), 0) % h
    p0s = jnp.where(row_in_img == 0, 0.0,
                    pltpu.roll(p0, shift=1, axis=0))
    p2s = jnp.where(row_in_img == h - 1, 0.0,
                    pltpu.roll(p2, shift=rows - 1, axis=0))
    return p1 + p0s + p2s


# ---------------------------------------------------------------------------
# Kernels
# ---------------------------------------------------------------------------
def _conv_stats_kernel(x_ref, w_ref, conv_ref, sum_ref, sq_ref):
    """Pass 1: conv1 + per-tile sum / sum-of-squares partials (f32)."""
    bt, h, wc_out = conv_ref.shape
    act = x_ref[...].reshape(bt * h, x_ref.shape[2])
    conv = _band_conv(act, w_ref[...], wc_out, h)                  # f32
    conv_ref[...] = conv.reshape(bt, h, wc_out).astype(conv_ref.dtype)
    sum_ref[0] = jnp.sum(conv, axis=0, keepdims=True)
    sq_ref[0] = jnp.sum(conv * conv, axis=0, keepdims=True)


def _bn_relu_conv_stats_kernel(c1_ref, scale_ref, shift_ref, w_ref,
                               conv_ref, sum_ref, sq_ref):
    """Pass 2: bn1 (precomputed scale/shift) + relu + conv2 + stats."""
    bt, h, wc_out = conv_ref.shape
    rows = bt * h
    c1 = c1_ref[...].reshape(rows, c1_ref.shape[2]).astype(jnp.float32)
    y = jnp.maximum(c1 * scale_ref[...] + shift_ref[...], 0.0)     # f32 BN+ReLU
    conv = _band_conv(y.astype(w_ref.dtype), w_ref[...], wc_out, h)
    conv_ref[...] = conv.reshape(bt, h, wc_out).astype(conv_ref.dtype)
    sum_ref[0] = jnp.sum(conv, axis=0, keepdims=True)
    sq_ref[0] = jnp.sum(conv * conv, axis=0, keepdims=True)


def _bn_add_relu_kernel(c2_ref, scale_ref, shift_ref, x_ref, out_ref):
    """Pass 3: bn2 + residual add + relu (lane-dense VPU epilogue, f32)."""
    bt, h, wc = out_ref.shape
    rows = bt * h
    c2 = c2_ref[...].reshape(rows, wc).astype(jnp.float32)
    ident = x_ref[...].reshape(rows, wc).astype(jnp.float32)
    z = c2 * scale_ref[...] + shift_ref[...] + ident
    out_ref[...] = jnp.maximum(z, 0.0).reshape(bt, h, wc).astype(out_ref.dtype)


# ---------------------------------------------------------------------------
# Wrapper helpers
# ---------------------------------------------------------------------------
def _batch_tile(n, h):
    """Images per grid step: fill the MXU (>=256 rows) but keep grid >= 2."""
    bt = max(1, 256 // h)
    bt = min(bt, n)
    if n >= 2:
        bt = min(bt, n // 2)     # v7x: >=2 grid steps -> both TensorCores used
    bt = max(bt, 1)
    while n % bt:                # exact divisor of the batch
        bt -= 1
    return bt


def _vmem_limit_bytes(blocked_bytes, resident_bytes):
    """Double-buffered blocked + resident operands + headroom, gen-aware cap."""
    try:
        cap = int(pltpu.get_tpu_info().vmem_capacity_bytes)
    except Exception:            # non-TPU trace / API drift -> conservative
        cap = 64 * 2**20
    want = 2 * blocked_bytes + 2 * resident_bytes + 2 * 2**20
    return int(max(16 * 2**20, min(cap * 3 // 4, want)))


# ---------------------------------------------------------------------------
# Wrapper
# ---------------------------------------------------------------------------
def basic_block(x_nchw, w1_oihw, g1, b1, w2_oihw, g2, b2,
                *, compute_dtype=jnp.bfloat16):
    """BasicBlock forward, NCHW in/out (PyTorch layout), training-mode BN.

    compute_dtype sets the MXU operand + intermediate-store dtype (bf16 by
    default); accumulation, BN statistics and elementwise math are always f32.
    """
    n, c, h, w = x_nchw.shape
    c_out = w1_oihw.shape[0]
    assert c_out == c and w2_oihw.shape[0] == c_out, \
        "identity residual path requires in_planes == planes"
    assert h % 8 == 0, "H must be a multiple of 8 (sublane tiling)"
    wc = w * c
    f32 = jnp.float32
    itemsize = jnp.dtype(compute_dtype).itemsize

    bt = _batch_tile(n, h)
    steps = n // bt

    # NCHW -> lane-dense (N, H, W*C); ONE copy in compute_dtype feeds both
    # conv1 (pass 1) and the residual add (pass 3).
    x_slab = jnp.transpose(x_nchw, (0, 2, 3, 1)).reshape(n, h, wc) \
                .astype(compute_dtype)
    wall1 = _band_conv_weights(w1_oihw, w).astype(compute_dtype)
    wall2 = _band_conv_weights(w2_oihw, w).astype(compute_dtype)

    conv_struct = jax.ShapeDtypeStruct((n, h, wc), compute_dtype)  # c1/c2
    out_struct = jax.ShapeDtypeStruct((n, h, wc), f32)
    stat_struct = jax.ShapeDtypeStruct((steps, 1, wc), f32)

    img_spec = pl.BlockSpec((bt, h, wc), lambda i: (i, 0, 0))
    stat_spec = pl.BlockSpec((1, 1, wc), lambda i: (i, 0, 0))
    wall_spec = pl.BlockSpec((wc, 3 * wc), lambda i: (0, 0))   # resident
    lane_spec = pl.BlockSpec((1, wc), lambda i: (0, 0))        # resident

    img_blk = bt * h * wc * itemsize          # compute_dtype image/interm. tile
    out_blk = bt * h * wc * 4                 # f32 output tile (pass 3)
    stat_blk = 2 * wc * 4
    wall_bytes = wc * 3 * wc * itemsize
    lane_bytes = 2 * wc * 4

    mxu_flops = 2 * n * h * wc * (3 * wc)

    def _params(blocked, resident):
        return pltpu.CompilerParams(
            dimension_semantics=("parallel",),   # shards batch over v7x's 2 TCs
            vmem_limit_bytes=_vmem_limit_bytes(blocked, resident))

    # ---- pass 1: conv1 + stats partials ------------------------------------
    c1, s1, q1 = pl.pallas_call(
        _conv_stats_kernel,
        grid=(steps,),
        in_specs=[img_spec, wall_spec],
        out_specs=[img_spec, stat_spec, stat_spec],
        out_shape=[conv_struct, stat_struct, stat_struct],
        compiler_params=_params(2 * img_blk + stat_blk, wall_bytes),
        cost_estimate=pl.CostEstimate(
            flops=mxu_flops, transcendentals=0,
            bytes_accessed=2 * n * h * wc * itemsize + wall1.size * itemsize
            + steps * stat_blk),
    )(x_slab, wall1)

    cnt = float(n * h * w)

    def _bn_scale_shift(sums, sumsqs, gamma, beta):
        # Tiny global finalize: single-pass biased variance (training BN).
        total = jnp.sum(sums, axis=(0, 1)).reshape(w, c).sum(axis=0)     # (C,)
        total_sq = jnp.sum(sumsqs, axis=(0, 1)).reshape(w, c).sum(axis=0)
        mean = total / cnt
        var = total_sq / cnt - mean * mean
        scale = gamma.astype(f32) * lax.rsqrt(var + _EPS)
        shift = beta.astype(f32) - mean * scale
        # Broadcast per-channel params across the lane-folded (w, c) axis.
        return (jnp.tile(scale, w).reshape(1, wc),
                jnp.tile(shift, w).reshape(1, wc))

    scale1, shift1 = _bn_scale_shift(s1, q1, g1, b1)

    # ---- pass 2: bn1 + relu + conv2 + stats partials ------------------------
    c2, s2, q2 = pl.pallas_call(
        _bn_relu_conv_stats_kernel,
        grid=(steps,),
        in_specs=[img_spec, lane_spec, lane_spec, wall_spec],
        out_specs=[img_spec, stat_spec, stat_spec],
        out_shape=[conv_struct, stat_struct, stat_struct],
        compiler_params=_params(2 * img_blk + stat_blk,
                                wall_bytes + lane_bytes),
        cost_estimate=pl.CostEstimate(
            flops=mxu_flops + 3 * n * h * wc, transcendentals=0,
            bytes_accessed=2 * n * h * wc * itemsize + wall2.size * itemsize
            + steps * stat_blk + lane_bytes),
    )(c1, scale1, shift1, wall2)

    scale2, shift2 = _bn_scale_shift(s2, q2, g2, b2)

    # ---- pass 3: bn2 + residual add + relu ----------------------------------
    out_slab = pl.pallas_call(
        _bn_add_relu_kernel,
        grid=(steps,),
        in_specs=[img_spec, lane_spec, lane_spec, img_spec],
        out_specs=img_spec,
        out_shape=out_struct,
        compiler_params=_params(2 * img_blk + out_blk, lane_bytes),
        cost_estimate=pl.CostEstimate(
            flops=4 * n * h * wc, transcendentals=0,
            bytes_accessed=2 * n * h * wc * itemsize + n * h * wc * 4
            + lane_bytes),
    )(c2, scale2, shift2, x_slab)

    # lane-dense slab -> NHWC -> NCHW (PyTorch layout).
    return jnp.transpose(out_slab.reshape(n, h, w, c), (0, 3, 1, 2))


# ---------------------------------------------------------------------------
# Pure-JAX reference (NCHW, matches PyTorch training-mode forward).
# ---------------------------------------------------------------------------
def ref_basic_block_nchw(x, w1, g1, b1, w2, g2, b2, eps=_EPS):
    dn = ("NCHW", "OIHW", "NCHW")

    def bn(o, g, b):
        m = o.mean(axis=(0, 2, 3), keepdims=True)
        v = ((o - m) ** 2).mean(axis=(0, 2, 3), keepdims=True)
        return (o - m) * lax.rsqrt(v + eps) * g.reshape(1, -1, 1, 1) \
            + b.reshape(1, -1, 1, 1)

    out = lax.conv_general_dilated(x, w1, (1, 1), ((1, 1), (1, 1)),
                                   dimension_numbers=dn)
    out = jnp.maximum(bn(out, g1, b1), 0.0)
    out = lax.conv_general_dilated(out, w2, (1, 1), ((1, 1), (1, 1)),
                                   dimension_numbers=dn)
    out = bn(out, g2, b2)
    return jnp.maximum(out + x, 0.0)


if __name__ == "__main__":
    # W * C = 128 -> slabs exactly fill the TPU's 128-wide lane axis.
    N, C, H, W = 2, 8, 16, 16
    key = jax.random.PRNGKey(0)
    kx, kw1, kw2 = jax.random.split(key, 3)

    x = jax.random.normal(kx, (N, C, H, W), jnp.float32)
    # PyTorch OIHW conv weights (planes, in_planes, 3, 3), no bias.
    w1 = jax.random.normal(kw1, (C, C, 3, 3), jnp.float32) * 0.1
    w2 = jax.random.normal(kw2, (C, C, 3, 3), jnp.float32) * 0.1
    # BatchNorm2d default init: weight=1, bias=0.
    g1 = jnp.ones((C,), jnp.float32)
    b1 = jnp.zeros((C,), jnp.float32)
    g2 = jnp.ones((C,), jnp.float32)
    b2 = jnp.zeros((C,), jnp.float32)

    ref = ref_basic_block_nchw(x, w1, g1, b1, w2, g2, b2)

    # bf16 MXU feed + bf16 intermediates (default fast path): f32 accumulation
    # and f32 BN/elementwise, so only bf16-rounding-level deviation from ref.
    out = jax.block_until_ready(jax.jit(basic_block)(x, w1, g1, b1, w2, g2, b2))
    assert out.shape == ref.shape == (N, C, H, W)
    err16 = float(jnp.max(jnp.abs(out - ref)))
    assert jnp.allclose(out, ref, atol=1e-1, rtol=1e-1), \
        f"bf16 max abs err {err16}"

    # f32 MXU feed: tight check against the f32 reference.
    run_f32 = jax.jit(functools.partial(basic_block,
                                        compute_dtype=jnp.float32))
    out_f32 = jax.block_until_ready(run_f32(x, w1, g1, b1, w2, g2, b2))
    err32 = float(jnp.max(jnp.abs(out_f32 - ref)))
    assert jnp.allclose(out_f32, ref, atol=5e-4, rtol=5e-4), \
        f"f32 max abs err {err32}"

    print("KERNEL_OK")
</pallas_src>

<mosaic_0001>
module attributes {stable_mosaic.version = 11 : i64} {
  func.func @_conv_stats_kernel(%arg0: i32, %arg1: memref<1x16x128xbf16, #tpu.memory_space<vmem>>, %arg2: memref<128x384xbf16, #tpu.memory_space<vmem>>, %arg3: memref<1x16x128xbf16, #tpu.memory_space<vmem>>, %arg4: memref<1x1x128xf32, #tpu.memory_space<vmem>>, %arg5: memref<1x1x128xf32, #tpu.memory_space<vmem>>) attributes {dimension_semantics = [#tpu.dimension_semantics<parallel>], iteration_bounds = array<i64: 2>, scalar_prefetch = 0 : i64, scratch_operands = 0 : i64, tpu.core_type = #tpu.core_type<tc>, window_params = [{transform_indices = @transform_0, window_bounds = array<i64: 1, 16, 128>}, {pipeline_mode = #tpu.pipeline_mode<synchronous>, transform_indices = @transform_1, window_bounds = array<i64: 128, 384>}, {transform_indices = @transform_2, window_bounds = array<i64: 1, 16, 128>}, {transform_indices = @transform_3, window_bounds = array<i64: 1, 1, 128>}, {transform_indices = @transform_4, window_bounds = array<i64: 1, 1, 128>}]} {
    %c0 = arith.constant 0 : index
    %c0_0 = arith.constant 0 : index
    %c0_1 = arith.constant 0 : index
    %0 = vector.load %arg1[%c0, %c0_0, %c0_1] : memref<1x16x128xbf16, #tpu.memory_space<vmem>>, vector<1x16x128xbf16>
    %1 = vector.shape_cast %0 : vector<1x16x128xbf16> to vector<16x128xbf16>
    %c0_2 = arith.constant 0 : index
    %c0_3 = arith.constant 0 : index
    %2 = vector.load %arg2[%c0_2, %c0_3] : memref<128x384xbf16, #tpu.memory_space<vmem>>, vector<128x384xbf16>
    %cst = arith.constant dense<0.000000e+00> : vector<16x384xf32>
    %3 = tpu.matmul %1, %2, %cst {dimension_numbers = #tpu.dot_dimension_numbers<[1], [0], [0], [1], [0, 0, 1, 1], [], []>} : vector<16x128xbf16>, vector<128x384xbf16>, vector<16x384xf32> -> vector<16x384xf32>
    %4 = vector.extract_strided_slice %3 {offsets = [0, 0], sizes = [16, 128], strides = [1, 1]} : vector<16x384xf32> to vector<16x128xf32>
    %5 = vector.extract_strided_slice %3 {offsets = [0, 128], sizes = [16, 128], strides = [1, 1]} : vector<16x384xf32> to vector<16x128xf32>
    %6 = vector.extract_strided_slice %3 {offsets = [0, 256], sizes = [16, 128], strides = [1, 1]} : vector<16x384xf32> to vector<16x128xf32>
    %7 = tpu.iota {dimensions = array<i32: 0>} : vector<16x128xi32>
    %c16_i32 = arith.constant 16 : i32
    %c0_i32 = arith.constant 0 : i32
    %8 = arith.cmpi eq, %c16_i32, %c0_i32 : i32
    %c1_i32 = arith.constant 1 : i32
    %9 = arith.select %8, %c1_i32, %c16_i32 : i32
    %10 = vector.broadcast %9 : i32 to vector<16x128xi32>
    %11 = arith.remsi %7, %10 : vector<16x128xi32>
    %c0_i32_4 = arith.constant 0 : i32
    %12 = vector.broadcast %c0_i32_4 : i32 to vector<16x128xi32>
    %13 = arith.cmpi ne, %11, %12 : vector<16x128xi32>
    %c0_i32_5 = arith.constant 0 : i32
    %14 = vector.broadcast %c0_i32_5 : i32 to vector<16x128xi32>
    %15 = arith.cmpi slt, %11, %14 : vector<16x128xi32>
    %c0_i32_6 = arith.constant 0 : i32
    %16 = arith.cmpi slt, %9, %c0_i32_6 : i32
    %17 = vector.broadcast %16 : i1 to vector<16x128xi1>
    %18 = vector.broadcast %17 : vector<16x128xi1> to vector<16x128xi1>
    %19 = arith.xori %15, %18 : vector<16x128xi1>
    %20 = arith.andi %19, %13 : vector<16x128xi1>
    %21 = vector.broadcast %9 : i32 to vector<16x128xi32>
    %22 = arith.addi %11, %21 : vector<16x128xi32>
    %23 = arith.select %20, %22, %11 : vector<16x128xi1>, vector<16x128xi32>
    %c0_i32_7 = arith.constant 0 : i32
    %24 = vector.broadcast %c0_i32_7 : i32 to vector<16x128xi32>
    %25 = arith.cmpi eq, %23, %24 : vector<16x128xi32>
    %c1_i32_8 = arith.constant 1 : i32
    %26 = tpu.dynamic_rotate %4 by %c1_i32_8 dim 0 : vector<16x128xf32>, i32 -> vector<16x128xf32>
    %cst_9 = arith.constant 0.000000e+00 : f32
    %27 = vector.broadcast %cst_9 : f32 to vector<16x128xf32>
    %28 = arith.select %25, %27, %26 : vector<16x128xi1>, vector<16x128xf32>
    %c15_i32 = arith.constant 15 : i32
    %29 = vector.broadcast %c15_i32 : i32 to vector<16x128xi32>
    %30 = arith.cmpi eq, %23, %29 : vector<16x128xi32>
    %c15_i32_10 = arith.constant 15 : i32
    %31 = tpu.dynamic_rotate %6 by %c15_i32_10 dim 0 : vector<16x128xf32>, i32 -> vector<16x128xf32>
    %cst_11 = arith.constant 0.000000e+00 : f32
    %32 = vector.broadcast %cst_11 : f32 to vector<16x128xf32>
    %33 = arith.select %30, %32, %31 : vector<16x128xi1>, vector<16x128xf32>
    %34 = arith.addf %5, %28 : vector<16x128xf32>
    %35 = arith.addf %34, %33 : vector<16x128xf32>
    %36 = vector.shape_cast %35 : vector<16x128xf32> to vector<1x16x128xf32>
    %37 = arith.truncf %36 : vector<1x16x128xf32> to vector<1x16x128xbf16>
    %c0_12 = arith.constant 0 : index
    %c0_13 = arith.constant 0 : index
    %c0_14 = arith.constant 0 : index
    %38 = vector.load %arg3[%c0_12, %c0_13, %c0_14] : memref<1x16x128xbf16, #tpu.memory_space<vmem>>, vector<1x16x128xbf16>
    tpu.vector_store %arg3[%c0_12, %c0_13, %c0_14], %37 {strides = array<i32>} : memref<1x16x128xbf16, #tpu.memory_space<vmem>>, vector<1x16x128xbf16>,
    %cst_15 = arith.constant dense<0.000000e+00> : vector<128xf32>
    %39 = vector.multi_reduction <add>, %35, %cst_15 [0] : vector<16x128xf32> to vector<128xf32>
    %40 = vector.shape_cast %39 : vector<128xf32> to vector<1x128xf32>
    %c0_16 = arith.constant 0 : index
    %c0_17 = arith.constant 0 : index
    %c0_18 = arith.constant 0 : index
    %41 = vector.load %arg4[%c0_16, %c0_17, %c0_18] : memref<1x1x128xf32, #tpu.memory_space<vmem>>, vector<1x1x128xf32>
    %42 = vector.shape_cast %41 : vector<1x1x128xf32> to vector<1x128xf32>
    %43 = vector.shape_cast %40 : vector<1x128xf32> to vector<1x1x128xf32>
    tpu.vector_store %arg4[%c0_16, %c0_17, %c0_18], %43 {strides = array<i32>} : memref<1x1x128xf32, #tpu.memory_space<vmem>>, vector<1x1x128xf32>,
    %44 = arith.mulf %35, %35 : vector<16x128xf32>
    %cst_19 = arith.constant dense<0.000000e+00> : vector<128xf32>
    %45 = vector.multi_reduction <add>, %44, %cst_19 [0] : vector<16x128xf32> to vector<128xf32>
    %46 = vector.shape_cast %45 : vector<128xf32> to vector<1x128xf32>
    %c0_20 = arith.constant 0 : index
    %c0_21 = arith.constant 0 : index
    %c0_22 = arith.constant 0 : index
    %47 = vector.load %arg5[%c0_20, %c0_21, %c0_22] : memref<1x1x128xf32, #tpu.memory_space<vmem>>, vector<1x1x128xf32>
    %48 = vector.shape_cast %47 : vector<1x1x128xf32> to vector<1x128xf32>
    %49 = vector.shape_cast %46 : vector<1x128xf32> to vector<1x1x128xf32>
    tpu.vector_store %arg5[%c0_20, %c0_21, %c0_22], %49 {strides = array<i32>} : memref<1x1x128xf32, #tpu.memory_space<vmem>>, vector<1x1x128xf32>,
    return
  }
  func.func @transform_0(%arg0: i32) -> (i32, i32, i32) {
    %c0_i32 = arith.constant 0 : i32
    %c0_i32_0 = arith.constant 0 : i32
    %c0_i32_1 = arith.constant 0 : i32
    return %arg0, %c0_i32, %c0_i32_0 : i32, i32, i32
  }
  func.func @transform_1(%arg0: i32) -> (i32, i32) {
    %c0_i32 = arith.constant 0 : i32
    %c0_i32_0 = arith.constant 0 : i32
    %c0_i32_1 = arith.constant 0 : i32
    return %c0_i32, %c0_i32_0 : i32, i32
  }
  func.func @transform_2(%arg0: i32) -> (i32, i32, i32) {
    %c0_i32 = arith.constant 0 : i32
    %c0_i32_0 = arith.constant 0 : i32
    %c0_i32_1 = arith.constant 0 : i32
    return %arg0, %c0_i32, %c0_i32_0 : i32, i32, i32
  }
  func.func @transform_3(%arg0: i32) -> (i32, i32, i32) {
    %c0_i32 = arith.constant 0 : i32
    %c0_i32_0 = arith.constant 0 : i32
    %c0_i32_1 = arith.constant 0 : i32
    return %arg0, %c0_i32, %c0_i32_0 : i32, i32, i32
  }
  func.func @transform_4(%arg0: i32) -> (i32, i32, i32) {
    %c0_i32 = arith.constant 0 : i32
    %c0_i32_0 = arith.constant 0 : i32
    %c0_i32_1 = arith.constant 0 : i32
    return %arg0, %c0_i32, %c0_i32_0 : i32, i32, i32
  }
}

module attributes {stable_mosaic.version = 11 : i64} {
  func.func @_bn_add_relu_kernel(%arg0: i32, %arg1: memref<1x16x128xbf16, #tpu.memory_space<vmem>>, %arg2: memref<1x128xf32, #tpu.memory_space<vmem>>, %arg3: memref<1x128xf32, #tpu.memory_space<vmem>>, %arg4: memref<1x16x128xbf16, #tpu.memory_space<vmem>>, %arg5: memref<1x16x128xf32, #tpu.memory_space<vmem>>) attributes {dimension_semantics = [#tpu.dimension_semantics<parallel>], iteration_bounds = array<i64: 2>, scalar_prefetch = 0 : i64, scratch_operands = 0 : i64, tpu.core_type = #tpu.core_type<tc>, window_params = [{transform_indices = @transform_0, window_bounds = array<i64: 1, 16, 128>}, {pipeline_mode = #tpu.pipeline_mode<synchronous>, transform_indices = @transform_1, window_bounds = array<i64: 1, 128>}, {pipeline_mode = #tpu.pipeline_mode<synchronous>, transform_indices = @transform_2, window_bounds = array<i64: 1, 128>}, {transform_indices = @transform_3, window_bounds = array<i64: 1, 16, 128>}, {transform_indices = @transform_4, window_bounds = array<i64: 1, 16, 128>}]} {
    %c0 = arith.constant 0 : index
    %c0_0 = arith.constant 0 : index
    %c0_1 = arith.constant 0 : index
    %0 = vector.load %arg1[%c0, %c0_0, %c0_1] : memref<1x16x128xbf16, #tpu.memory_space<vmem>>, vector<1x16x128xbf16>
    %1 = vector.shape_cast %0 : vector<1x16x128xbf16> to vector<16x128xbf16>
    %2 = arith.extf %1 : vector<16x128xbf16> to vector<16x128xf32>
    %c0_2 = arith.constant 0 : index
    %c0_3 = arith.constant 0 : index
    %c0_4 = arith.constant 0 : index
    %3 = vector.load %arg4[%c0_2, %c0_3, %c0_4] : memref<1x16x128xbf16, #tpu.memory_space<vmem>>, vector<1x16x128xbf16>
    %4 = vector.shape_cast %3 : vector<1x16x128xbf16> to vector<16x128xbf16>
    %5 = arith.extf %4 : vector<16x128xbf16> to vector<16x128xf32>
    %c0_5 = arith.constant 0 : index
    %c0_6 = arith.constant 0 : index
    %6 = vector.load %arg2[%c0_5, %c0_6] : memref<1x128xf32, #tpu.memory_space<vmem>>, vector<1x128xf32>
    %7 = vector.broadcast %6 : vector<1x128xf32> to vector<16x128xf32>
    %8 = arith.mulf %2, %7 : vector<16x128xf32>
    %c0_7 = arith.constant 0 : index
    %c0_8 = arith.constant 0 : index
    %9 = vector.load %arg3[%c0_7, %c0_8] : memref<1x128xf32, #tpu.memory_space<vmem>>, vector<1x128xf32>
    %10 = vector.broadcast %9 : vector<1x128xf32> to vector<16x128xf32>
    %11 = arith.addf %8, %10 : vector<16x128xf32>
    %12 = arith.addf %11, %5 : vector<16x128xf32>
    %cst = arith.constant 0.000000e+00 : f32
    %13 = vector.broadcast %cst : f32 to vector<16x128xf32>
    %14 = arith.maximumf %12, %13 : vector<16x128xf32>
    %15 = vector.shape_cast %14 : vector<16x128xf32> to vector<1x16x128xf32>
    %c0_9 = arith.constant 0 : index
    %c0_10 = arith.constant 0 : index
    %c0_11 = arith.constant 0 : index
    %16 = vector.load %arg5[%c0_9, %c0_10, %c0_11] : memref<1x16x128xf32, #tpu.memory_space<vmem>>, vector<1x16x128xf32>
    tpu.vector_store %arg5[%c0_9, %c0_10, %c0_11], %15 {strides = array<i32>} : memref<1x16x128xf32, #tpu.memory_space<vmem>>, vector<1x16x128xf32>,
    return
  }
  func.func @transform_0(%arg0: i32) -> (i32, i32, i32) {
    %c0_i32 = arith.constant 0 : i32
    %c0_i32_0 = arith.constant 0 : i32
    %c0_i32_1 = arith.constant 0 : i32
    return %arg0, %c0_i32, %c0_i32_0 : i32, i32, i32
  }
  func.func @transform_1(%arg0: i32) -> (i32, i32) {
    %c0_i32 = arith.constant 0 : i32
    %c0_i32_0 = arith.constant 0 : i32
    %c0_i32_1 = arith.constant 0 : i32
    return %c0_i32, %c0_i32_0 : i32, i32
  }
  func.func @transform_2(%arg0: i32) -> (i32, i32) {
    %c0_i32 = arith.constant 0 : i32
    %c0_i32_0 = arith.constant 0 : i32
    %c0_i32_1 = arith.constant 0 : i32
    return %c0_i32, %c0_i32_0 : i32, i32
  }
  func.func @transform_3(%arg0: i32) -> (i32, i32, i32) {
    %c0_i32 = arith.constant 0 : i32
    %c0_i32_0 = arith.constant 0 : i32
    %c0_i32_1 = arith.constant 0 : i32
    return %arg0, %c0_i32, %c0_i32_0 : i32, i32, i32
  }
  func.func @transform_4(%arg0: i32) -> (i32, i32, i32) {
    %c0_i32 = arith.constant 0 : i32
    %c0_i32_0 = arith.constant 0 : i32
    %c0_i32_1 = arith.constant 0 : i32
    return %arg0, %c0_i32, %c0_i32_0 : i32, i32, i32
  }
}

module attributes {stable_mosaic.version = 11 : i64} {
  func.func @_bn_relu_conv_stats_kernel(%arg0: i32, %arg1: memref<1x16x128xbf16, #tpu.memory_space<vmem>>, %arg2: memref<1x128xf32, #tpu.memory_space<vmem>>, %arg3: memref<1x128xf32, #tpu.memory_space<vmem>>, %arg4: memref<128x384xbf16, #tpu.memory_space<vmem>>, %arg5: memref<1x16x128xbf16, #tpu.memory_space<vmem>>, %arg6: memref<1x1x128xf32, #tpu.memory_space<vmem>>, %arg7: memref<1x1x128xf32, #tpu.memory_space<vmem>>) attributes {dimension_semantics = [#tpu.dimension_semantics<parallel>], iteration_bounds = array<i64: 2>, scalar_prefetch = 0 : i64, scratch_operands = 0 : i64, tpu.core_type = #tpu.core_type<tc>, window_params = [{transform_indices = @transform_0, window_bounds = array<i64: 1, 16, 128>}, {pipeline_mode = #tpu.pipeline_mode<synchronous>, transform_indices = @transform_1, window_bounds = array<i64: 1, 128>}, {pipeline_mode = #tpu.pipeline_mode<synchronous>, transform_indices = @transform_2, window_bounds = array<i64: 1, 128>}, {pipeline_mode = #tpu.pipeline_mode<synchronous>, transform_indices = @transform_3, window_bounds = array<i64: 128, 384>}, {transform_indices = @transform_4, window_bounds = array<i64: 1, 16, 128>}, {transform_indices = @transform_5, window_bounds = array<i64: 1, 1, 128>}, {transform_indices = @transform_6, window_bounds = array<i64: 1, 1, 128>}]} {
    %c0 = arith.constant 0 : index
    %c0_0 = arith.constant 0 : index
    %c0_1 = arith.constant 0 : index
    %0 = vector.load %arg1[%c0, %c0_0, %c0_1] : memref<1x16x128xbf16, #tpu.memory_space<vmem>>, vector<1x16x128xbf16>
    %1 = vector.shape_cast %0 : vector<1x16x128xbf16> to vector<16x128xbf16>
    %2 = arith.extf %1 : vector<16x128xbf16> to vector<16x128xf32>
    %c0_2 = arith.constant 0 : index
    %c0_3 = arith.constant 0 : index
    %3 = vector.load %arg2[%c0_2, %c0_3] : memref<1x128xf32, #tpu.memory_space<vmem>>, vector<1x128xf32>
    %4 = vector.broadcast %3 : vector<1x128xf32> to vector<16x128xf32>
    %5 = arith.mulf %2, %4 : vector<16x128xf32>
    %c0_4 = arith.constant 0 : index
    %c0_5 = arith.constant 0 : index
    %6 = vector.load %arg3[%c0_4, %c0_5] : memref<1x128xf32, #tpu.memory_space<vmem>>, vector<1x128xf32>
    %7 = vector.broadcast %6 : vector<1x128xf32> to vector<16x128xf32>
    %8 = arith.addf %5, %7 : vector<16x128xf32>
    %cst = arith.constant 0.000000e+00 : f32
    %9 = vector.broadcast %cst : f32 to vector<16x128xf32>
    %10 = arith.maximumf %8, %9 : vector<16x128xf32>
    %11 = arith.truncf %10 : vector<16x128xf32> to vector<16x128xbf16>
    %c0_6 = arith.constant 0 : index
    %c0_7 = arith.constant 0 : index
    %12 = vector.load %arg4[%c0_6, %c0_7] : memref<128x384xbf16, #tpu.memory_space<vmem>>, vector<128x384xbf16>
    %cst_8 = arith.constant dense<0.000000e+00> : vector<16x384xf32>
    %13 = tpu.matmul %11, %12, %cst_8 {dimension_numbers = #tpu.dot_dimension_numbers<[1], [0], [0], [1], [0, 0, 1, 1], [], []>} : vector<16x128xbf16>, vector<128x384xbf16>, vector<16x384xf32> -> vector<16x384xf32>
    %14 = vector.extract_strided_slice %13 {offsets = [0, 0], sizes = [16, 128], strides = [1, 1]} : vector<16x384xf32> to vector<16x128xf32>
    %15 = vector.extract_strided_slice %13 {offsets = [0, 128], sizes = [16, 128], strides = [1, 1]} : vector<16x384xf32> to vector<16x128xf32>
    %16 = vector.extract_strided_slice %13 {offsets = [0, 256], sizes = [16, 128], strides = [1, 1]} : vector<16x384xf32> to vector<16x128xf32>
    %17 = tpu.iota {dimensions = array<i32: 0>} : vector<16x128xi32>
    %c16_i32 = arith.constant 16 : i32
    %c0_i32 = arith.constant 0 : i32
    %18 = arith.cmpi eq, %c16_i32, %c0_i32 : i32
    %c1_i32 = arith.constant 1 : i32
    %19 = arith.select %18, %c1_i32, %c16_i32 : i32
    %20 = vector.broadcast %19 : i32 to vector<16x128xi32>
    %21 = arith.remsi %17, %20 : vector<16x128xi32>
    %c0_i32_9 = arith.constant 0 : i32
    %22 = vector.broadcast %c0_i32_9 : i32 to vector<16x128xi32>
    %23 = arith.cmpi ne, %21, %22 : vector<16x128xi32>
    %c0_i32_10 = arith.constant 0 : i32
    %24 = vector.broadcast %c0_i32_10 : i32 to vector<16x128xi32>
    %25 = arith.cmpi slt, %21, %24 : vector<16x128xi32>
    %c0_i32_11 = arith.constant 0 : i32
    %26 = arith.cmpi slt, %19, %c0_i32_11 : i32
    %27 = vector.broadcast %26 : i1 to vector<16x128xi1>
    %28 = vector.broadcast %27 : vector<16x128xi1> to vector<16x128xi1>
    %29 = arith.xori %25, %28 : vector<16x128xi1>
    %30 = arith.andi %29, %23 : vector<16x128xi1>
    %31 = vector.broadcast %19 : i32 to vector<16x128xi32>
    %32 = arith.addi %21, %31 : vector<16x128xi32>
    %33 = arith.select %30, %32, %21 : vector<16x128xi1>, vector<16x128xi32>
    %c0_i32_12 = arith.constant 0 : i32
    %34 = vector.broadcast %c0_i32_12 : i32 to vector<16x128xi32>
    %35 = arith.cmpi eq, %33, %34 : vector<16x128xi32>
    %c1_i32_13 = arith.constant 1 : i32
    %36 = tpu.dynamic_rotate %14 by %c1_i32_13 dim 0 : vector<16x128xf32>, i32 -> vector<16x128xf32>
    %cst_14 = arith.constant 0.000000e+00 : f32
    %37 = vector.broadcast %cst_14 : f32 to vector<16x128xf32>
    %38 = arith.select %35, %37, %36 : vector<16x128xi1>, vector<16x128xf32>
    %c15_i32 = arith.constant 15 : i32
    %39 = vector.broadcast %c15_i32 : i32 to vector<16x128xi32>
    %40 = arith.cmpi eq, %33, %39 : vector<16x128xi32>
    %c15_i32_15 = arith.constant 15 : i32
    %41 = tpu.dynamic_rotate %16 by %c15_i32_15 dim 0 : vector<16x128xf32>, i32 -> vector<16x128xf32>
    %cst_16 = arith.constant 0.000000e+00 : f32
    %42 = vector.broadcast %cst_16 : f32 to vector<16x128xf32>
    %43 = arith.select %40, %42, %41 : vector<16x128xi1>, vector<16x128xf32>
    %44 = arith.addf %15, %38 : vector<16x128xf32>
    %45 = arith.addf %44, %43 : vector<16x128xf32>
    %46 = vector.shape_cast %45 : vector<16x128xf32> to vector<1x16x128xf32>
    %47 = arith.truncf %46 : vector<1x16x128xf32> to vector<1x16x128xbf16>
    %c0_17 = arith.constant 0 : index
    %c0_18 = arith.constant 0 : index
    %c0_19 = arith.constant 0 : index
    %48 = vector.load %arg5[%c0_17, %c0_18, %c0_19] : memref<1x16x128xbf16, #tpu.memory_space<vmem>>, vector<1x16x128xbf16>
    tpu.vector_store %arg5[%c0_17, %c0_18, %c0_19], %47 {strides = array<i32>} : memref<1x16x128xbf16, #tpu.memory_space<vmem>>, vector<1x16x128xbf16>,
    %cst_20 = arith.constant dense<0.000000e+00> : vector<128xf32>
    %49 = vector.multi_reduction <add>, %45, %cst_20 [0] : vector<16x128xf32> to vector<128xf32>
    %50 = vector.shape_cast %49 : vector<128xf32> to vector<1x128xf32>
    %c0_21 = arith.constant 0 : index
    %c0_22 = arith.constant 0 : index
    %c0_23 = arith.constant 0 : index
    %51 = vector.load %arg6[%c0_21, %c0_22, %c0_23] : memref<1x1x128xf32, #tpu.memory_space<vmem>>, vector<1x1x128xf32>
    %52 = vector.shape_cast %51 : vector<1x1x128xf32> to vector<1x128xf32>
    %53 = vector.shape_cast %50 : vector<1x128xf32> to vector<1x1x128xf32>
    tpu.vector_store %arg6[%c0_21, %c0_22, %c0_23], %53 {strides = array<i32>} : memref<1x1x128xf32, #tpu.memory_space<vmem>>, vector<1x1x128xf32>,
    %54 = arith.mulf %45, %45 : vector<16x128xf32>
    %cst_24 = arith.constant dense<0.000000e+00> : vector<128xf32>
    %55 = vector.multi_reduction <add>, %54, %cst_24 [0] : vector<16x128xf32> to vector<128xf32>
    %56 = vector.shape_cast %55 : vector<128xf32> to vector<1x128xf32>
    %c0_25 = arith.constant 0 : index
    %c0_26 = arith.constant 0 : index
    %c0_27 = arith.constant 0 : index
    %57 = vector.load %arg7[%c0_25, %c0_26, %c0_27] : memref<1x1x128xf32, #tpu.memory_space<vmem>>, vector<1x1x128xf32>
    %58 = vector.shape_cast %57 : vector<1x1x128xf32> to vector<1x128xf32>
    %59 = vector.shape_cast %56 : vector<1x128xf32> to vector<1x1x128xf32>
    tpu.vector_store %arg7[%c0_25, %c0_26, %c0_27], %59 {strides = array<i32>} : memref<1x1x128xf32, #tpu.memory_space<vmem>>, vector<1x1x128xf32>,
    return
  }
  func.func @transform_0(%arg0: i32) -> (i32, i32, i32) {
    %c0_i32 = arith.constant 0 : i32
    %c0_i32_0 = arith.constant 0 : i32
    %c0_i32_1 = arith.constant 0 : i32
    return %arg0, %c0_i32, %c0_i32_0 : i32, i32, i32
  }
  func.func @transform_1(%arg0: i32) -> (i32, i32) {
    %c0_i32 = arith.constant 0 : i32
    %c0_i32_0 = arith.constant 0 : i32
    %c0_i32_1 = arith.constant 0 : i32
    return %c0_i32, %c0_i32_0 : i32, i32
  }
  func.func @transform_2(%arg0: i32) -> (i32, i32) {
    %c0_i32 = arith.constant 0 : i32
    %c0_i32_0 = arith.constant 0 : i32
    %c0_i32_1 = arith.constant 0 : i32
    return %c0_i32, %c0_i32_0 : i32, i32
  }
  func.func @transform_3(%arg0: i32) -> (i32, i32) {
    %c0_i32 = arith.constant 0 : i32
    %c0_i32_0 = arith.constant 0 : i32
    %c0_i32_1 = arith.constant 0 : i32
    return %c0_i32, %c0_i32_0 : i32, i32
  }
  func.func @transform_4(%arg0: i32) -> (i32, i32, i32) {
    %c0_i32 = arith.constant 0 : i32
    %c0_i32_0 = arith.constant 0 : i32
    %c0_i32_1 = arith.constant 0 : i32
    return %arg0, %c0_i32, %c0_i32_0 : i32, i32, i32
  }
  func.func @transform_5(%arg0: i32) -> (i32, i32, i32) {
    %c0_i32 = arith.constant 0 : i32
    %c0_i32_0 = arith.constant 0 : i32
    %c0_i32_1 = arith.constant 0 : i32
    return %arg0, %c0_i32, %c0_i32_0 : i32, i32, i32
  }
  func.func @transform_6(%arg0: i32) -> (i32, i32, i32) {
    %c0_i32 = arith.constant 0 : i32
    %c0_i32_0 = arith.constant 0 : i32
    %c0_i32_1 = arith.constant 0 : i32
    return %arg0, %c0_i32, %c0_i32_0 : i32, i32, i32
  }
}

</mosaic_0001>

<bundles_post_ra>
// kernel: basic_block.3
= control target key start
LH: loop header
LB: loop body
LE: loop exit
PB: predicated region body
PF: predicated region fallthrough
CT: control target
= control target key end

     0   :  { %s806_s15 = smov 0   ;;  %s916_s0 = inlined_call_operand.vmem [shape: bf16[2,16,128], index: 0, kind: input, shape index: {}]   ;;  %s917_s1 = inlined_call_operand.vmem [shape: bf16[128,384], index: 1, kind: input, shape index: {}]   ;;  %s918_s2 = inlined_call_operand.vmem [shape: bf16[2,16,128], index: 2, kind: output, shape index: {0}]   ;;  %s919_s3 = inlined_call_operand.vmem [shape: f32[2,1,128], index: 3, kind: output, shape index: {1}]   ;;  %s920_s4 = inlined_call_operand.vmem [shape: f32[2,1,128], index: 4, kind: output, shape index: {2}]  }
   0x1 LB: > { %s650_s16 = sadd.s32 4294967295, %s776_s15   ;;  %p654_p0 = scmp.ge.s32.totalorder %s776_s15, 1  ;;  %s776_s15 = sphi %s806_s15, %s15_s15  }
   0x2   : > { %p167_p1 = scmp.lt.s32.totalorder %s776_s15, 3 }
   0x4   : > { %p168_p2 = pnand %p654_p0, %p167_p1 }
   0x5   : > { %p199_p3 = scmp.lt.s32.totalorder (!%p168_p2), %s650_s16, 1 }
   0x6   : > { %171 = sbr.rel (%p168_p2) target bundleno = 267 (0x10b), region = 28 }
   0xb   : > { %v737_v0 = vld [vmem:[%s917_s1 + $0xac] ss:$12 sps:$4 sm:$0xff]   ;;  %v778_v1 = vmov 0.0   ;;  %v739_v2 = vld [vmem:[%s917_s1 + $0xb0] ss:$12 sps:$4 sm:$0xff]   ;;  %vm779_vm0 = vmmov 0   ;;  %v468_v27 = vlaneseq }
   0xc   : > { %706 = vmatprep.subr.bf16.mxu1 %v778_v1  ;;  %722 = vmatprep.mubr.msk.bf16.mxu1 %vm779_vm0, %v778_v1  ;;  %v740_v3 = vld [vmem:[%s917_s1 + $0xa8] ss:$12 sps:$4 sm:$0xff]   ;;  %v780_v5 = vmov 0   ;;  %v743_v6 = vld [vmem:[%s917_s1 + $0x98] ss:$12 sps:$4 sm:$0xff]   ;;  %s922_s16 = smov (!%p199_p3, %s650_s16), 1 }
   0xd   : > { %384 = vmatprep.subr.bf16.mxu0 %v737_v0  ;;  %707 = vmatpush3.bf16.msra.mxu1 %v739_v2  ;;  %v741_v4 = vld [vmem:[%s917_s1 + $0x94] ss:$12 sps:$4 sm:$0xff]   ;;  %v744_v7 = vld [vmem:[%s917_s1 + $0x90] ss:$12 sps:$4 sm:$0xff]   ;;  %v748_v10 = vld [vmem:[%s917_s1 + $0x78] ss:$12 sps:$4 sm:$0xff]   ;;  %s214_s29 = scalar_lea.vmem %s920_s4, %s922_s16 }
   0xe   : > { %416 = vmatprep.mubr.bf16.mxu0 %v780_v5  ;;  %385 = vmatpush1.bf16.msra.mxu0 %v740_v3  ;;  %v745_v8 = vld [vmem:[%s917_s1 + $0x7c] ss:$12 sps:$4 sm:$0xff]   ;;  %v747_v9 = vld [vmem:[%s917_s1 + $0x80] ss:$12 sps:$4 sm:$0xff]   ;;  %v749_v11 = vld [vmem:[%s917_s1 + $0x64] ss:$12 sps:$4 sm:$0xff]  }
   0xf   : > { %708 = vmatprep.subr.bf16.mxu1 %v778_v1  ;;  %386 = vmatprep.subr.bf16.mxu0 %v741_v4  ;;  %v751_v12 = vld [vmem:[%s917_s1 + $0x68] ss:$12 sps:$4 sm:$0xff]   ;;  %v752_v13 = vld [vmem:[%s917_s1 + $0x60] ss:$12 sps:$4 sm:$0xff]   ;;  %s688_s19 = sshll.u32 %s922_s16, 3  ;;  %v469_v28 = vshrl.u32 %v468_v27, 7 }
  0x10   : > { %v753_v14 = vld [vmem:[%s917_s1 + $0x4c] ss:$12 sps:$4 sm:$0xff]   ;;  %v755_v15 = vld [vmem:[%s917_s1 + $0x50] ss:$12 sps:$4 sm:$0xff]   ;;  %v756_v16 = vld [vmem:[%s917_s1 + $0x48] ss:$12 sps:$4 sm:$0xff]   ;;  %s203_s28 = scalar_lea.vmem %s916_s0, %s688_s19  ;;  %s208_s24 = scalar_lea.vmem %s918_s2, %s688_s19 }
  0x11   : > { %709 = vmatpush3.bf16.msra.mxu1 %v743_v6  ;;  %v757_v17 = vld [vmem:[%s917_s1 + $0x34] ss:$12 sps:$4 sm:$0xff]   ;;  %v759_v18 = vld [vmem:[%s917_s1 + $0x38] ss:$12 sps:$4 sm:$0xff]   ;;  %v760_v19 = vld [vmem:[%s917_s1 + $0x30] ss:$12 sps:$4 sm:$0xff]   ;;  %s211_s19 = scalar_lea.vmem %s919_s3, %s922_s16 }
  0x12   : > { %387 = vmatpush1.bf16.msra.mxu0 %v744_v7  ;;  %710 = vmatprep.subr.bf16.mxu1 %v778_v1  ;;  %v761_v20 = vld [vmem:[%s917_s1 + $0x1c] ss:$12 sps:$4 sm:$0xff]   ;;  %v763_v21 = vld [vmem:[%s917_s1 + $0x20] ss:$12 sps:$4 sm:$0xff]   ;;  %v764_v22 = vld [vmem:[%s917_s1 + $0x18] ss:$12 sps:$4 sm:$0xff]  }
  0x13   : > { %388 = vmatprep.subr.bf16.mxu0 %v745_v8  ;;  %v765_v23 = vld [vmem:[%s917_s1 + $0x4] ss:$12 sps:$4 sm:$0xff]   ;;  %v767_v24 = vld [vmem:[%s917_s1 + $0x8] ss:$12 sps:$4 sm:$0xff]   ;;  %v768_v25 = vld [vmem:[%s917_s1] ss:$12 sps:$4 sm:$0xff]  }
  0x14   : > { %v769_v26 = vld [vmem:[%s203_s28] sm:$0xff]   ;;  %v470_v29 = vadd.s32 8, %v469_v28  ;;  %v475_v33 = vand.u32 15, %v469_v28  ;;  %vm508_vm1 = vcmp.lt.s32.totalorder %v469_v28, 7  ;;  %vm499_vm2 = vcmp.lt.s32.totalorder %v469_v28, 1 }
  0x15   : > { %711 = vmatpush3.bf16.msra.mxu1 %v747_v9 }
  0x16   : > { %389 = vmatpush1.bf16.msra.mxu0 %v748_v10  ;;  %712 = vmatprep.subr.bf16.mxu1 %v778_v1  ;;  %v482_v36 = vand.u32 15, %v470_v29  ;;  %vm495_vm3 = vcmp.eq.s32.totalorder %v475_v33, 0 }
  0x17   : > { %390 = vmatprep.subr.bf16.mxu0 %v749_v11 }
  0x18   : > { %vm505_vm4 = vcmp.eq.s32.totalorder %v482_v36, 15 }
  0x19   : > { %713 = vmatpush3.bf16.msra.mxu1 %v751_v12 }
  0x1a   : > { %391 = vmatpush1.bf16.msra.mxu0 %v752_v13  ;;  %714 = vmatprep.subr.bf16.mxu1 %v778_v1 }
  0x1b   : > { %392 = vmatprep.subr.bf16.mxu0 %v753_v14 }
  0x1d   : > { %715 = vmatpush3.bf16.msra.mxu1 %v755_v15 }
  0x1e   : > { %393 = vmatpush1.bf16.msra.mxu0 %v756_v16  ;;  %716 = vmatprep.subr.bf16.mxu1 %v778_v1 }
  0x1f   : > { %394 = vmatprep.subr.bf16.mxu0 %v757_v17 }
  0x21   : > { %717 = vmatpush3.bf16.msra.mxu1 %v759_v18 }
  0x22   : > { %395 = vmatpush1.bf16.msra.mxu0 %v760_v19  ;;  %718 = vmatprep.subr.bf16.mxu1 %v778_v1 }
  0x23   : > { %396 = vmatprep.subr.bf16.mxu0 %v761_v20 }
  0x25   : > { %719 = vmatpush3.bf16.msra.mxu1 %v763_v21 }
  0x26   : > { %397 = vmatpush1.bf16.msra.mxu0 %v764_v22  ;;  %720 = vmatprep.subr.bf16.mxu1 %v778_v1 }
  0x27   : > { %398 = vmatprep.subr.bf16.mxu0 %v765_v23 }
  0x29   : > { %721 = vmatpush3.bf16.msra.mxu1 %v767_v24 }
  0x2a   : > { %399 = vmatpush1.bf16.msra.mxu0 %v768_v25 }
  0x2c   : > { %723 = vmatmul.mubr.bf16.vlgmr.msra.gmra.mxu1 %v769_v26 }
  0x2d   : > { %417 = vmatmul.mubr.bf16.vlgmr.msra.gmra.mxu0 %v769_v26 }
  0xec   : > { %v461_v30 = vpop.f32.mrf.mxu1 }
  0xed   : > { %v418_v31 = vpop.f32.mrf.mxu0  ;;  %v506_v34 = vrot.slane %v461_v30, 1 }
  0xee   : > { %v724_v32 = vpop.f32.mrf.mxu1  ;;  %v497_v40 = vrot.slane %v418_v31, 7 }
  0xef   : > { %v420_v35 = vpop.f32.mrf.mxu0 }
  0xf0   : > { %v464_v37 = vpop.f32.mrf.mxu1 }
  0xf1   : > { %v507_v38 = vrot.slane %v464_v37, 1  ;;  %v422_v39 = vpop.f32.mrf.mxu0 }
  0xf2   : > { %v498_v41 = vrot.slane %v422_v39, 7  ;;  %v725_v42 = vpop.f32.mrf.mxu1 }
  0xf3   : > { %v424_v43 = vpop.f32.mrf.mxu0  ;;  %v510_v44 = vsel %vm508_vm1, %v507_v38, %v506_v34  ;;  %v509_v51 = vsel %vm508_vm1, %v506_v34, %v507_v38 }
  0xf4   : > { %v500_v45 = vsel %vm499_vm2, %v497_v40, %v498_v41  ;;  %v501_v46 = vsel %vm499_vm2, %v498_v41, %v497_v40  ;;  %v512_v49 = vsel %vm505_vm4, 0.0, %v510_v44 }
  0xf5   : > { %v502_v47 = vsel %vm495_vm3, 0.0, %v501_v46  ;;  %v514_v48 = vadd.f32 %v500_v45, %v424_v43 }
  0xf6   : > { %v513_v50 = vadd.f32 %v502_v47, %v420_v35 }
  0xf7   : > { %v516_v52 = vadd.f32 %v514_v48, %v512_v49 }
  0xf8   : > { %v515_v53 = vadd.f32 %v513_v50, %v509_v51 }
  0xf9   : > { %v536_v54 = vmul.f32 %v516_v52, %v516_v52 }
  0xfa   : > { %v695_v55 = vpack.c.bf16 %v516_v52, %v515_v53  ;;  %v527_v56 = vadd.f32 %v516_v52, %v515_v53  ;;  %v535_v57 = vmul.f32 %v515_v53, %v515_v53 }
  0xfc   : > { %696 = vst [vmem:[%s208_s24] sm:$0xff] %v695_v55   ;;  %v528_v58 = vrot.slane %v527_v56, 4  ;;  %v537_v59 = vadd.f32 %v536_v54, %v535_v57 }
  0xfe   : > { %v529_v60 = vadd.f32 %v528_v58, %v527_v56  ;;  %v538_v61 = vrot.slane %v537_v59, 4 }
 0x100   : > { %v530_v62 = vrot.slane %v529_v60, 2  ;;  %v539_v63 = vadd.f32 %v538_v61, %v537_v59 }
 0x102   : > { %v531_v0 = vadd.f32 %v530_v62, %v529_v60  ;;  %v540_v1 = vrot.slane %v539_v63, 2 }
 0x104   : > { %v532_v2 = vrot.slane %v531_v0, 1  ;;  %v541_v3 = vadd.f32 %v540_v1, %v539_v63 }
 0x106   : > { %v533_v4 = vadd.f32 %v532_v2, %v531_v0  ;;  %v542_v5 = vrot.slane %v541_v3, 1 }
 0x108   : > { %534 = vst [vmem:[%s211_s19] sm:$0x1] %v533_v4  ;;  %v543_v6 = vadd.f32 %v542_v5, %v541_v3 }
 0x10a   : > { %544 = vst [vmem:[%s214_s29] sm:$0x1] %v543_v6 }
 0x10b PF: > { %s15_s15 = sadd.s32 1, %s776_s15  }
 0x10c   : > { %p12_p4 = scmp.ge.s32.totalorder %s15_s15, 4  }
 0x10e   :  { %14 = sbr.rel (!%p12_p4) target bundleno = 1 (0x1), region = 82 }

// kernel: tile.23
= control target key start
LH: loop header
LB: loop body
LE: loop exit
PB: predicated region body
PF: predicated region fallthrough
CT: control target
= control target key end

     0   :  { %s28_s0 = inlined_call_operand.vmem [shape: f32[8], index: 0, kind: input, shape index: {}]   ;;  %s29_s1 = inlined_call_operand.vmem [shape: f32[16,8], index: 1, kind: output, shape index: {}]  }
   0x1   :  { %v4_v0 = vld [vmem:[%s28_s0] ss:$0 sm:$0xff] }
   0x2   :  { %5 = vst [vmem:[%s29_s1] sm:$0xff] %v4_v0  ;;  %8 = vst [vmem:[%s29_s1 + $0x8] sm:$0xff] %v4_v0 }

// kernel: tile.24
= control target key start
LH: loop header
LB: loop body
LE: loop exit
PB: predicated region body
PF: predicated region fallthrough
CT: control target
= control target key end

     0   :  { %s133_s10 = smov 120   ;;  %s134_s11 = smov 104   ;;  %vm3_vm0 = vcmask 64512   ;;  %vm9_vm1 = vcmask 1048512   ;;  %vm15_vm2 = vcmask 982912   ;;  %vm21_vm3 = vcmask 917312   ;;  %s209_s0 = inlined_call_operand.vmem [shape: f32[16,8], index: 0, kind: input, shape index: {}]   ;;  %s210_s1 = inlined_call_operand.vmem [shape: f32[1,128], index: 1, kind: output, shape index: {}]  }
   0x1   :  { %v103_v0 = vld [vmem:[%s209_s0 + $0xf] sm:$0x1]   ;;  %v105_v1 = vld [vmem:[%s209_s0 + $0xd] sm:$0x1]   ;;  %v104_v2 = vld [vmem:[%s209_s0 + $0xe] sm:$0x1]  }
   0x2   :  { %7 = vrot.lane.b32.xlu0 %v103_v0, %s133_s10  ;;  %19 = vrot.lane.b32.xlu1 %v105_v1, %s134_s11  ;;  %v106_v3 = vld [vmem:[%s209_s0 + $0xc] sm:$0x1]   ;;  %s135_s16 = smov 112   ;;  %s136_s17 = smov 96   ;;  %v107_v4 = vld [vmem:[%s209_s0 + $0xb] sm:$0x1]  }
   0x3   :  { %v108_v5 = vld [vmem:[%s209_s0 + $0xa] sm:$0x1]   ;;  %v2_v6 = vld [vmem:[%s209_s0] sm:$0x1]   ;;  %s137_s24 = smov 88   ;;  %s138_s25 = smov 80  }
   0x4   :  { %4 = vst.msk [vmem:[#allocation0] sm:$0x1] %vm3_vm0, %v2_v6   ;;  %v109_v7 = vld [vmem:[%s209_s0 + $0x9] sm:$0x1]   ;;  %v110_v8 = vld [vmem:[%s209_s0 + $0x8] sm:$0x1]  }
   0x5   :  { %s139_s30 = smov 72   ;;  %s140_s2 = smov 64   ;;  %v111_v9 = vld [vmem:[%s209_s0 + $0x7] sm:$0x1]   ;;  %v112_v10 = vld [vmem:[%s209_s0 + $0x6] sm:$0x1]  }
   0x6   :  { %13 = vrot.lane.b32.xlu0 %v104_v2, %s135_s16  ;;  %25 = vrot.lane.b32.xlu1 %v106_v3, %s136_s17  ;;  %s141_s7 = smov 56   ;;  %s142_s8 = smov 48   ;;  %v113_v11 = vld [vmem:[%s209_s0 + $0x5] sm:$0x1]   ;;  %v114_v12 = vld [vmem:[%s209_s0 + $0x4] sm:$0x1]  }
   0x7   :  { %s143_s13 = smov 40   ;;  %s144_s14 = smov 32   ;;  %v115_v13 = vld [vmem:[%s209_s0 + $0x3] sm:$0x1]   ;;  %v116_v14 = vld [vmem:[%s209_s0 + $0x2] sm:$0x1]  }
   0x8   :  { %s145_s19 = smov 24   ;;  %s146_s20 = smov 16   ;;  %v117_v15 = vld [vmem:[%s209_s0 + $0x1] sm:$0x1]   ;;  %vm27_vm4 = vcmask 851712   ;;  %vm33_vm5 = vcmask 786112  }
   0x9   :  { %s147_s0 = smov 8   ;;  %vm39_vm6 = vcmask 720512   ;;  %vm45_vm7 = vcmask 654912   ;;  %vm51_vm8 = vcmask 589312   ;;  %vm57_vm9 = vcmask 523712  }
   0xa   :  { %31 = vrot.lane.b32.xlu0 %v107_v4, %s137_s24  ;;  %37 = vrot.lane.b32.xlu1 %v108_v5, %s138_s25  ;;  %vm63_vm10 = vcmask 458112   ;;  %vm69_vm11 = vcmask 392512   ;;  %vm75_vm12 = vcmask 326912   ;;  %vm81_vm13 = vcmask 261312  }
   0xb   :  { %vm87_vm14 = vcmask 195712   ;;  %vm93_vm15 = vcmask 130112  }
   0xe   :  { %43 = vrot.lane.b32.xlu0 %v109_v7, %s139_s30  ;;  %49 = vrot.lane.b32.xlu1 %v110_v8, %s140_s2 }
  0x12   :  { %55 = vrot.lane.b32.xlu0 %v111_v9, %s141_s7  ;;  %61 = vrot.lane.b32.xlu1 %v112_v10, %s142_s8 }
  0x16   :  { %67 = vrot.lane.b32.xlu0 %v113_v11, %s143_s13  ;;  %73 = vrot.lane.b32.xlu1 %v114_v12, %s144_s14 }
  0x1a   :  { %79 = vrot.lane.b32.xlu0 %v115_v13, %s145_s19  ;;  %85 = vrot.lane.b32.xlu1 %v116_v14, %s146_s20 }
  0x1e   :  { %91 = vrot.lane.b32.xlu0 %v117_v15, %s147_s0 }
  0x74   :  { %v8_v16 = vpop.permute.xlu0 %7   ;;  %v20_v17 = vpop.permute.xlu1 %19  }
  0x75   :  { %10 = vst.msk [vmem:[#allocation0] sm:$0x1] %vm9_vm1, %v8_v16  }
  0x78   :  { %v14_v18 = vpop.permute.xlu0 %13   ;;  %v26_v19 = vpop.permute.xlu1 %25  }
  0x79   :  { %16 = vst.msk [vmem:[#allocation0] sm:$0x1] %vm15_vm2, %v14_v18  }
  0x7a   :  { %22 = vst.msk [vmem:[#allocation0] sm:$0x1] %vm21_vm3, %v20_v17  }
  0x7b   :  { %28 = vst.msk [vmem:[#allocation0] sm:$0x1] %vm27_vm4, %v26_v19  }
  0x7c   :  { %v32_v20 = vpop.permute.xlu0 %31   ;;  %v38_v21 = vpop.permute.xlu1 %37  }
  0x7d   :  { %34 = vst.msk [vmem:[#allocation0] sm:$0x1] %vm33_vm5, %v32_v20  }
  0x7e   :  { %40 = vst.msk [vmem:[#allocation0] sm:$0x1] %vm39_vm6, %v38_v21  }
  0x80   :  { %v44_v22 = vpop.permute.xlu0 %43   ;;  %v50_v23 = vpop.permute.xlu1 %49  }
  0x81   :  { %46 = vst.msk [vmem:[#allocation0] sm:$0x1] %vm45_vm7, %v44_v22  }
  0x82   :  { %52 = vst.msk [vmem:[#allocation0] sm:$0x1] %vm51_vm8, %v50_v23  }
  0x84   :  { %v56_v24 = vpop.permute.xlu0 %55   ;;  %v62_v25 = vpop.permute.xlu1 %61  }
  0x85   :  { %58 = vst.msk [vmem:[#allocation0] sm:$0x1] %vm57_vm9, %v56_v24  }
  0x86   :  { %64 = vst.msk [vmem:[#allocation0] sm:$0x1] %vm63_vm10, %v62_v25  }
  0x88   :  { %v68_v26 = vpop.permute.xlu0 %67   ;;  %v74_v27 = vpop.permute.xlu1 %73  }
  0x89   :  { %70 = vst.msk [vmem:[#allocation0] sm:$0x1] %vm69_vm11, %v68_v26  }
  0x8a   :  { %76 = vst.msk [vmem:[#allocation0] sm:$0x1] %vm75_vm12, %v74_v27  }
  0x8c   :  { %v80_v28 = vpop.permute.xlu0 %79   ;;  %v86_v29 = vpop.permute.xlu1 %85  }
  0x8d   :  { %82 = vst.msk [vmem:[#allocation0] sm:$0x1] %vm81_vm13, %v80_v28  }
  0x8e   :  { %88 = vst.msk [vmem:[#allocation0] sm:$0x1] %vm87_vm14, %v86_v29  }
  0x90   :  { %v92_v30 = vpop.permute.xlu0 %91  }
  0x91   :  { %94 = vst.msk [vmem:[#allocation0] sm:$0x1] %vm93_vm15, %v92_v30  }
  0x98   :  { %v99_v31 = vld [vmem:[#allocation0] sm:$0x1] }
  0x99   :  { %102 = vst [vmem:[%s210_s1] sm:$0x1] %v99_v31 }

// kernel: basic_block.5
= control target key start
LH: loop header
LB: loop body
LE: loop exit
PB: predicated region body
PF: predicated region fallthrough
CT: control target
= control target key end

     0   :  { %s384_s15 = smov 0   ;;  %s410_s0 = inlined_call_operand.vmem [shape: bf16[2,16,128], index: 0, kind: input, shape index: {}]   ;;  %s411_s1 = inlined_call_operand.vmem [shape: f32[1,128], index: 1, kind: input, shape index: {}]   ;;  %s412_s2 = inlined_call_operand.vmem [shape: f32[1,128], index: 2, kind: input, shape index: {}]   ;;  %s413_s3 = inlined_call_operand.vmem [shape: bf16[2,16,128], index: 3, kind: input, shape index: {}]   ;;  %s414_s4 = inlined_call_operand.vmem [shape: f32[2,16,128], index: 4, kind: output, shape index: {}]  }
   0x1 LB: > { %s317_s16 = sadd.s32 4294967295, %s357_s15   ;;  %p321_p0 = scmp.ge.s32.totalorder %s357_s15, 1  ;;  %s357_s15 = sphi %s384_s15, %s14_s15  }
   0x2   : > { %p172_p1 = scmp.lt.s32.totalorder %s357_s15, 3 }
   0x4   : > { %p173_p2 = pnand %p321_p0, %p172_p1 }
   0x5   : > { %p203_p3 = scmp.lt.s32.totalorder (!%p173_p2), %s317_s16, 1 }
   0x6   : > { %176 = sbr.rel (%p173_p2) target bundleno = 26 (0x1a), region = 36 }
   0xb   : > { %s416_s16 = smov (!%p203_p3, %s317_s16), 1  ;;  %v328_v2 = vld [vmem:[%s411_s1] ss:$0 sm:$0xff] }
   0xc   : > { %s332_s17 = sshll.u32 %s416_s16, 3  ;;  %v329_v5 = vld [vmem:[%s412_s2] ss:$0 sm:$0xff]  ;;  %s334_s28 = sshll.u32 %s416_s16, 4 }
   0xd   : > { %s207_s20 = scalar_lea.vmem %s410_s0, %s332_s17  ;;  %s212_s23 = scalar_lea.vmem %s413_s3, %s332_s17 }
   0xe   : > { %v336_v0 = vld [vmem:[%s207_s20] sm:$0xff]   ;;  %s217_s5 = scalar_lea.vmem %s414_s4, %s334_s28 }
   0xf   : > { %v340_v1 = vld [vmem:[%s212_s23] sm:$0xff]   ;;  %v337_v3 = vunpack.c.l.bf16 %v336_v0  ;;  %v338_v4 = vunpack.c.h.bf16 %v336_v0 }
  0x10   : > { %v341_v6 = vunpack.c.l.bf16 %v340_v1  ;;  %v342_v8 = vunpack.c.h.bf16 %v340_v1 }
  0x11   : > { %v233_v7 = vmul.f32 %v337_v3, %v328_v2  ;;  %v234_v9 = vmul.f32 %v338_v4, %v328_v2 }
  0x13   : > { %v242_v10 = vadd.f32 %v329_v5, %v233_v7  ;;  %v243_v11 = vadd.f32 %v329_v5, %v234_v9 }
  0x15   : > { %v244_v12 = vadd.f32 %v341_v6, %v242_v10  ;;  %v245_v13 = vadd.f32 %v342_v8, %v243_v11 }
  0x17   : > { %v246_v14 = vmax.f32 %v244_v12, 0.0  ;;  %v247_v15 = vmax.f32 %v245_v13, 0.0 }
  0x19   : > { %248 = vst [vmem:[%s217_s5] sm:$0xff] %v246_v14  ;;  %249 = vst [vmem:[%s217_s5 + $0x8] sm:$0xff] %v247_v15 }
  0x1a PF: > { %s14_s15 = sadd.s32 1, %s357_s15  }
  0x1b   : > { %p11_p4 = scmp.ge.s32.totalorder %s14_s15, 4  }
  0x1d   :  { %13 = sbr.rel (!%p11_p4) target bundleno = 1 (0x1), region = 69 }

// kernel: basic_block.4
= control target key start
LH: loop header
LB: loop body
LE: loop exit
PB: predicated region body
PF: predicated region fallthrough
CT: control target
= control target key end

     0   :  { %s891_s21 = smov 0   ;;  %s1012_s0 = inlined_call_operand.vmem [shape: bf16[2,16,128], index: 0, kind: input, shape index: {}]   ;;  %s1013_s1 = inlined_call_operand.vmem [shape: f32[1,128], index: 1, kind: input, shape index: {}]   ;;  %s1014_s2 = inlined_call_operand.vmem [shape: f32[1,128], index: 2, kind: input, shape index: {}]   ;;  %s1015_s3 = inlined_call_operand.vmem [shape: bf16[128,384], index: 3, kind: input, shape index: {}]   ;;  %s1016_s4 = inlined_call_operand.vmem [shape: bf16[2,16,128], index: 4, kind: output, shape index: {0}]   ;;  %s1017_s5 = inlined_call_operand.vmem [shape: f32[2,1,128], index: 5, kind: output, shape index: {1}]   ;;  %s1018_s6 = inlined_call_operand.vmem [shape: f32[2,1,128], index: 6, kind: output, shape index: {2}]  }
   0x1 LB: > { %s721_s22 = sadd.s32 4294967295, %s851_s21   ;;  %p725_p0 = scmp.ge.s32.totalorder %s851_s21, 1  ;;  %s851_s21 = sphi %s891_s21, %s17_s21  }
   0x2   : > { %p217_p1 = scmp.lt.s32.totalorder %s851_s21, 3 }
   0x4   : > { %p218_p2 = pnand %p725_p0, %p217_p1 }
   0x5   : > { %p253_p3 = scmp.lt.s32.totalorder (!%p218_p2), %s721_s22, 1 }
   0x6   : > { %221 = sbr.rel (%p218_p2) target bundleno = 267 (0x10b), region = 36 }
   0xb   : > { %v813_v0 = vld [vmem:[%s1015_s3 + $0xac] ss:$12 sps:$4 sm:$0xff]   ;;  %v853_v1 = vmov 0.0   ;;  %v815_v2 = vld [vmem:[%s1015_s3 + $0xb0] ss:$12 sps:$4 sm:$0xff]   ;;  %vm854_vm0 = vmmov 0   ;;  %v539_v38 = vlaneseq }
   0xc   : > { %782 = vmatprep.subr.bf16.mxu1 %v853_v1  ;;  %798 = vmatprep.mubr.msk.bf16.mxu1 %vm854_vm0, %v853_v1  ;;  %v816_v3 = vld [vmem:[%s1015_s3 + $0xa8] ss:$12 sps:$4 sm:$0xff]   ;;  %v855_v5 = vmov 0   ;;  %v819_v6 = vld [vmem:[%s1015_s3 + $0x98] ss:$12 sps:$4 sm:$0xff]   ;;  %s1020_s22 = smov (!%p253_p3, %s721_s22), 1 }
   0xd   : > { %455 = vmatprep.subr.bf16.mxu0 %v813_v0  ;;  %783 = vmatpush3.bf16.msra.mxu1 %v815_v2  ;;  %v817_v4 = vld [vmem:[%s1015_s3 + $0x94] ss:$12 sps:$4 sm:$0xff]   ;;  %v820_v7 = vld [vmem:[%s1015_s3 + $0x90] ss:$12 sps:$4 sm:$0xff]   ;;  %v824_v10 = vld [vmem:[%s1015_s3 + $0x78] ss:$12 sps:$4 sm:$0xff]   ;;  %s268_s19 = scalar_lea.vmem %s1018_s6, %s1020_s22 }
   0xe   : > { %487 = vmatprep.mubr.bf16.mxu0 %v855_v5  ;;  %456 = vmatpush1.bf16.msra.mxu0 %v816_v3  ;;  %v821_v8 = vld [vmem:[%s1015_s3 + $0x7c] ss:$12 sps:$4 sm:$0xff]   ;;  %v823_v9 = vld [vmem:[%s1015_s3 + $0x80] ss:$12 sps:$4 sm:$0xff]   ;;  %v825_v11 = vld [vmem:[%s1015_s3 + $0x64] ss:$12 sps:$4 sm:$0xff]  }
   0xf   : > { %784 = vmatprep.subr.bf16.mxu1 %v853_v1  ;;  %457 = vmatprep.subr.bf16.mxu0 %v817_v4  ;;  %v827_v12 = vld [vmem:[%s1015_s3 + $0x68] ss:$12 sps:$4 sm:$0xff]   ;;  %v828_v13 = vld [vmem:[%s1015_s3 + $0x60] ss:$12 sps:$4 sm:$0xff]   ;;  %s760_s25 = sshll.u32 %s1020_s22, 3  ;;  %v540_v39 = vshrl.u32 %v539_v38, 7 }
  0x10   : > { %v829_v14 = vld [vmem:[%s1015_s3 + $0x4c] ss:$12 sps:$4 sm:$0xff]   ;;  %v831_v15 = vld [vmem:[%s1015_s3 + $0x50] ss:$12 sps:$4 sm:$0xff]   ;;  %s257_s8 = scalar_lea.vmem %s1012_s0, %s760_s25  ;;  %v832_v16 = vld [vmem:[%s1015_s3 + $0x48] ss:$12 sps:$4 sm:$0xff]   ;;  %s262_s14 = scalar_lea.vmem %s1016_s4, %s760_s25 }
  0x11   : > { %785 = vmatpush3.bf16.msra.mxu1 %v819_v6  ;;  %v833_v17 = vld [vmem:[%s1015_s3 + $0x34] ss:$12 sps:$4 sm:$0xff]   ;;  %v835_v19 = vld [vmem:[%s1015_s3 + $0x38] ss:$12 sps:$4 sm:$0xff]   ;;  %v836_v23 = vld [vmem:[%s1015_s3 + $0x30] ss:$12 sps:$4 sm:$0xff]   ;;  %s265_s25 = scalar_lea.vmem %s1017_s5, %s1020_s22 }
  0x12   : > { %458 = vmatpush1.bf16.msra.mxu0 %v820_v7  ;;  %786 = vmatprep.subr.bf16.mxu1 %v853_v1  ;;  %v765_v18 = vld [vmem:[%s257_s8] sm:$0xff]   ;;  %v837_v25 = vld [vmem:[%s1015_s3 + $0x1c] ss:$12 sps:$4 sm:$0xff]   ;;  %v541_v40 = vadd.s32 8, %v540_v39  ;;  %v546_v44 = vand.u32 15, %v540_v39  ;;  %vm579_vm1 = vcmp.lt.s32.totalorder %v540_v39, 7 }
  0x13   : > { %459 = vmatprep.subr.bf16.mxu0 %v821_v8  ;;  %v766_v20 = vunpack.c.l.bf16 %v765_v18  ;;  %v767_v21 = vunpack.c.h.bf16 %v765_v18  ;;  %v730_v22 = vld [vmem:[%s1013_s1] ss:$0 sm:$0xff]  ;;  %v840_v31 = vld [vmem:[%s1015_s3 + $0x18] ss:$12 sps:$4 sm:$0xff]   ;;  %v843_v35 = vld [vmem:[%s1015_s3 + $0x8] ss:$12 sps:$4 sm:$0xff]  }
  0x14   : > { %v731_v24 = vld [vmem:[%s1014_s2] ss:$0 sm:$0xff]  ;;  %v841_v32 = vld [vmem:[%s1015_s3 + $0x4] ss:$12 sps:$4 sm:$0xff]   ;;  %v553_v47 = vand.u32 15, %v541_v40  ;;  %vm570_vm2 = vcmp.lt.s32.totalorder %v540_v39, 1 }
  0x15   : > { %787 = vmatpush3.bf16.msra.mxu1 %v823_v9  ;;  %v281_v26 = vmul.f32 %v766_v20, %v730_v22  ;;  %v282_v27 = vmul.f32 %v767_v21, %v730_v22  ;;  %v839_v28 = vld [vmem:[%s1015_s3 + $0x20] ss:$12 sps:$4 sm:$0xff]   ;;  %vm566_vm3 = vcmp.eq.s32.totalorder %v546_v44, 0 }
  0x16   : > { %460 = vmatpush1.bf16.msra.mxu0 %v824_v10  ;;  %788 = vmatprep.subr.bf16.mxu1 %v853_v1  ;;  %v844_v36 = vld [vmem:[%s1015_s3] ss:$12 sps:$4 sm:$0xff]   ;;  %vm576_vm4 = vcmp.eq.s32.totalorder %v553_v47, 15 }
  0x17   : > { %461 = vmatprep.subr.bf16.mxu0 %v825_v11  ;;  %v290_v29 = vadd.f32 %v731_v24, %v281_v26  ;;  %v291_v30 = vadd.f32 %v731_v24, %v282_v27 }
  0x19   : > { %789 = vmatpush3.bf16.msra.mxu1 %v827_v12  ;;  %v292_v33 = vmax.f32 %v290_v29, 0.0  ;;  %v293_v34 = vmax.f32 %v291_v30, 0.0 }
  0x1a   : > { %462 = vmatpush1.bf16.msra.mxu0 %v828_v13  ;;  %790 = vmatprep.subr.bf16.mxu1 %v853_v1 }
  0x1b   : > { %463 = vmatprep.subr.bf16.mxu0 %v829_v14  ;;  %v294_v37 = vpack.c.bf16 %v293_v34, %v292_v33 }
  0x1d   : > { %791 = vmatpush3.bf16.msra.mxu1 %v831_v15 }
  0x1e   : > { %464 = vmatpush1.bf16.msra.mxu0 %v832_v16  ;;  %792 = vmatprep.subr.bf16.mxu1 %v853_v1 }
  0x1f   : > { %465 = vmatprep.subr.bf16.mxu0 %v833_v17 }
  0x21   : > { %793 = vmatpush3.bf16.msra.mxu1 %v835_v19 }
  0x22   : > { %466 = vmatpush1.bf16.msra.mxu0 %v836_v23  ;;  %794 = vmatprep.subr.bf16.mxu1 %v853_v1 }
  0x23   : > { %467 = vmatprep.subr.bf16.mxu0 %v837_v25 }
  0x25   : > { %795 = vmatpush3.bf16.msra.mxu1 %v839_v28 }
  0x26   : > { %468 = vmatpush1.bf16.msra.mxu0 %v840_v31  ;;  %796 = vmatprep.subr.bf16.mxu1 %v853_v1 }
  0x27   : > { %469 = vmatprep.subr.bf16.mxu0 %v841_v32 }
  0x29   : > { %797 = vmatpush3.bf16.msra.mxu1 %v843_v35 }
  0x2a   : > { %470 = vmatpush1.bf16.msra.mxu0 %v844_v36 }
  0x2c   : > { %799 = vmatmul.mubr.bf16.vlgmr.msra.gmra.mxu1 %v294_v37 }
  0x2d   : > { %488 = vmatmul.mubr.bf16.vlgmr.msra.gmra.mxu0 %v294_v37 }
  0xec   : > { %v532_v41 = vpop.f32.mrf.mxu1 }
  0xed   : > { %v489_v42 = vpop.f32.mrf.mxu0  ;;  %v577_v45 = vrot.slane %v532_v41, 1 }
  0xee   : > { %v800_v43 = vpop.f32.mrf.mxu1  ;;  %v568_v51 = vrot.slane %v489_v42, 7 }
  0xef   : > { %v491_v46 = vpop.f32.mrf.mxu0 }
  0xf0   : > { %v535_v48 = vpop.f32.mrf.mxu1 }
  0xf1   : > { %v578_v49 = vrot.slane %v535_v48, 1  ;;  %v493_v50 = vpop.f32.mrf.mxu0 }
  0xf2   : > { %v569_v52 = vrot.slane %v493_v50, 7  ;;  %v801_v53 = vpop.f32.mrf.mxu1 }
  0xf3   : > { %v495_v54 = vpop.f32.mrf.mxu0  ;;  %v581_v55 = vsel %vm579_vm1, %v578_v49, %v577_v45  ;;  %v580_v62 = vsel %vm579_vm1, %v577_v45, %v578_v49 }
  0xf4   : > { %v571_v56 = vsel %vm570_vm2, %v568_v51, %v569_v52  ;;  %v572_v57 = vsel %vm570_vm2, %v569_v52, %v568_v51  ;;  %v583_v60 = vsel %vm576_vm4, 0.0, %v581_v55 }
  0xf5   : > { %v573_v58 = vsel %vm566_vm3, 0.0, %v572_v57  ;;  %v585_v59 = vadd.f32 %v571_v56, %v495_v54 }
  0xf6   : > { %v584_v61 = vadd.f32 %v573_v58, %v491_v46 }
  0xf7   : > { %v587_v63 = vadd.f32 %v585_v59, %v583_v60 }
  0xf8   : > { %v586_v0 = vadd.f32 %v584_v61, %v580_v62 }
  0xf9   : > { %v607_v1 = vmul.f32 %v587_v63, %v587_v63 }
  0xfa   : > { %v771_v2 = vpack.c.bf16 %v587_v63, %v586_v0  ;;  %v598_v3 = vadd.f32 %v587_v63, %v586_v0  ;;  %v606_v4 = vmul.f32 %v586_v0, %v586_v0 }
  0xfc   : > { %772 = vst [vmem:[%s262_s14] sm:$0xff] %v771_v2   ;;  %v599_v5 = vrot.slane %v598_v3, 4  ;;  %v608_v6 = vadd.f32 %v607_v1, %v606_v4 }
  0xfe   : > { %v600_v7 = vadd.f32 %v599_v5, %v598_v3  ;;  %v609_v8 = vrot.slane %v608_v6, 4 }
 0x100   : > { %v601_v9 = vrot.slane %v600_v7, 2  ;;  %v610_v10 = vadd.f32 %v609_v8, %v608_v6 }
 0x102   : > { %v602_v11 = vadd.f32 %v601_v9, %v600_v7  ;;  %v611_v12 = vrot.slane %v610_v10, 2 }
 0x104   : > { %v603_v13 = vrot.slane %v602_v11, 1  ;;  %v612_v14 = vadd.f32 %v611_v12, %v610_v10 }
 0x106   : > { %v604_v15 = vadd.f32 %v603_v13, %v602_v11  ;;  %v613_v16 = vrot.slane %v612_v14, 1 }
 0x108   : > { %605 = vst [vmem:[%s265_s25] sm:$0x1] %v604_v15  ;;  %v614_v17 = vadd.f32 %v613_v16, %v612_v14 }
 0x10a   : > { %615 = vst [vmem:[%s268_s19] sm:$0x1] %v614_v17 }
 0x10b PF: > { %s17_s21 = sadd.s32 1, %s851_s21  }
 0x10c   : > { %p14_p4 = scmp.ge.s32.totalorder %s17_s21, 4  }
 0x10e   :  { %16 = sbr.rel (!%p14_p4) target bundleno = 1 (0x1), region = 90 }

</bundles_post_ra>
